<compile_context>
chip_gen: v5e
topology: v5e:2x2
jax: 0.10.0
libtpu: 0.0.40
codegen_flags: <defaults>
</compile_context>

<pallas_src>
import jax
import jax.numpy as jnp
from jax.experimental import pallas as pl
from jax.experimental.pallas import tpu as pltpu


_LANE = 128
_EPS = 1e-5


def _round_up(n, m):
    return ((n + m - 1) // m) * m


def _full_spec(shape):
    # whole-array block (no grid); index_map takes zero grid args
    return pl.BlockSpec(shape, lambda: (0,) * len(shape))


# ----------------------------------------------------------------------------
# Fused kernel:  ((x @ W_i + b_i) -> BN -> ReLU) * num_hidden  ->  x @ W_L + b_L
#
# Ref layout (inputs, then output):
#   refs[0]                        : x            (M, K0_pad)   bf16
#   refs[1+4i .. 1+4i+3]           : W_i (bf16), b_i, gamma_i, beta_i (f32)
#   refs[-3], refs[-2]             : W_last (bf16), b_last (f32)
#   refs[-1]                       : out          (M, 128)      f32 (lane-dense)
# ----------------------------------------------------------------------------
def _make_fused_kernel(num_hidden):
    def kernel(*refs):
        out_ref = refs[-1]
        h = refs[0][...]                                   # bf16 activations
        idx = 1
        for _ in range(num_hidden):
            w_ref, b_ref, g_ref, be_ref = refs[idx:idx + 4]
            idx += 4
            # MXU: bf16 x bf16 -> f32 accumulate
            z = jnp.dot(h, w_ref[...], preferred_element_type=jnp.float32)
            z = z + b_ref[...]
            # BatchNorm1d (training forward): per-column stats over all rows,
            # biased variance, folded into a single scale/shift per column.
            mean = jnp.mean(z, axis=0, keepdims=True)
            c = z - mean
            var = jnp.mean(c * c, axis=0, keepdims=True)
            scale = g_ref[...] * jax.lax.rsqrt(var + _EPS)  # rsqrt -> EUP slot
            shift = be_ref[...] - mean * scale
            h = jnp.maximum(z * scale + shift, 0.0).astype(jnp.bfloat16)
        # Final projection, fused.  Output is padded to 128 lanes (zero weight
        # columns), so the store is a full, unmasked lane-dense vst.
        w_ref, b_ref = refs[idx], refs[idx + 1]
        y = jnp.dot(h, w_ref[...], preferred_element_type=jnp.float32)
        out_ref[...] = y + b_ref[...]

    return kernel


# ----------------------------------------------------------------------------
# Parameter construction (deterministic, mimics the module's __init__ shapes).
# Linear weights are stored transposed relative to PyTorch: (in, out).
# ----------------------------------------------------------------------------
def init_out_layer_params(key, in_num, layer_num, inter_num=512):
    params = []
    for i in range(layer_num):
        if i == layer_num - 1:
            lin_in = in_num if layer_num == 1 else inter_num
            lin_out = 1
        else:
            lin_in = in_num if i == 0 else inter_num
            lin_out = inter_num
        key, kw, kb = jax.random.split(key, 3)
        bound = 1.0 / jnp.sqrt(jnp.float32(lin_in))
        w = jax.random.uniform(kw, (lin_in, lin_out), jnp.float32, -bound, bound)
        b = jax.random.uniform(kb, (1, lin_out), jnp.float32, -bound, bound)
        layer = {"w": w, "b": b}
        if i != layer_num - 1:
            layer["gamma"] = jnp.ones((1, lin_out), jnp.float32)
            layer["beta"] = jnp.zeros((1, lin_out), jnp.float32)
        params.append(layer)
    return params


# ----------------------------------------------------------------------------
# Wrapper: pad feature dims to multiples of 128, flatten (B, N, F) -> (M, F),
# run the single fused pallas_call, slice the real output column back out.
# Padded input columns are zero and pair with zero-padded weight rows, so they
# contribute nothing; padded hidden columns produce exact zeros after BN+ReLU
# (beta pad = 0) and feed zero weight rows in the next layer.
# ----------------------------------------------------------------------------
@jax.jit
def out_layer_forward(params, x):
    """x: (batch, node_num, in_num) -> (batch, node_num, 1)"""
    B, Nn, F = x.shape
    M = B * Nn
    n_layers = len(params)
    num_hidden = n_layers - 1

    x2d = x.reshape(M, F).astype(jnp.float32)
    F_pad = _round_up(F, _LANE)
    x2d = jnp.pad(x2d, ((0, 0), (0, F_pad - F))).astype(jnp.bfloat16)

    inputs = [x2d]
    in_dim, in_pad = F, F_pad
    for i, layer in enumerate(params):
        w, b = layer["w"], layer["b"]
        out_dim = w.shape[1]
        out_pad = _round_up(out_dim, _LANE)
        w_p = jnp.pad(w, ((0, in_pad - in_dim), (0, out_pad - out_dim)))
        b_p = jnp.pad(b, ((0, 0), (0, out_pad - out_dim)))
        inputs.append(w_p.astype(jnp.bfloat16))
        inputs.append(b_p.astype(jnp.float32))
        if i != n_layers - 1:
            g_p = jnp.pad(layer["gamma"], ((0, 0), (0, out_pad - out_dim)))
            be_p = jnp.pad(layer["beta"], ((0, 0), (0, out_pad - out_dim)))
            inputs.append(g_p.astype(jnp.float32))
            inputs.append(be_p.astype(jnp.float32))
        in_dim, in_pad = out_dim, out_pad

    out_pad_final = in_pad  # padded width of the final (., 1) projection

    # Rough VMEM footprint (params + a few live f32 activation slabs + output);
    # raise the scoped limit for large M, stay conservative for small shapes.
    est = sum(int(a.size) * a.dtype.itemsize for a in inputs)
    widest = max(int(a.shape[1]) for a in inputs[1:])
    est += 3 * M * widest * 4 + M * out_pad_final * 4
    vmem_limit = int(max(32 * 2 ** 20, min(64 * 2 ** 20, 2 * est)))

    out = pl.pallas_call(
        _make_fused_kernel(num_hidden),
        out_shape=jax.ShapeDtypeStruct((M, out_pad_final), jnp.float32),
        in_specs=[_full_spec(tuple(a.shape)) for a in inputs],
        out_specs=_full_spec((M, out_pad_final)),
        compiler_params=pltpu.CompilerParams(vmem_limit_bytes=vmem_limit),
    )(*inputs)

    return out[:, :1].reshape(B, Nn, 1)


# ----------------------------------------------------------------------------
# Pure-JAX reference with the same numerics (bf16 matmul inputs, f32 accumulate
# and f32 BN/ReLU) on the UNPADDED shapes — also validates the padding logic.
# ----------------------------------------------------------------------------
def out_layer_reference(params, x):
    B, Nn, F = x.shape
    out = x.reshape(B * Nn, F).astype(jnp.float32)
    n_layers = len(params)
    for i, layer in enumerate(params):
        out = jnp.dot(
            out.astype(jnp.bfloat16),
            layer["w"].astype(jnp.bfloat16),
            preferred_element_type=jnp.float32,
        ) + layer["b"]
        if i != n_layers - 1:
            mean = jnp.mean(out, axis=0, keepdims=True)
            var = jnp.mean((out - mean) ** 2, axis=0, keepdims=True)
            out = (out - mean) * jax.lax.rsqrt(var + _EPS)
            out = out * layer["gamma"] + layer["beta"]
            out = jnp.maximum(out, 0.0)
    return out.reshape(B, Nn, 1)


if __name__ == "__main__":
    # Small shapes consistent with the module: in_num=32, node_num=8,
    # layer_num=2, inter_num=64, batch=2.   x: (batch, node_num, in_num)
    batch, node_num, in_num = 2, 8, 32
    layer_num, inter_num = 2, 64

    key = jax.random.PRNGKey(0)
    key, kx = jax.random.split(key)
    x = jax.random.normal(kx, (batch, node_num, in_num), jnp.float32)

    params = init_out_layer_params(key, in_num, layer_num, inter_num)

    y = jax.block_until_ready(out_layer_forward(params, x))
    y_ref = jax.block_until_ready(out_layer_reference(params, x))

    assert y.shape == (batch, node_num, 1)
    max_diff = float(jnp.max(jnp.abs(y - y_ref)))
    assert jnp.allclose(y, y_ref, atol=2e-3, rtol=2e-3), (
        f"mismatch vs reference: max abs diff {max_diff}"
    )

    print("KERNEL_OK")
</pallas_src>

<mosaic_0001>
module attributes {stable_mosaic.version = 11 : i64} {
  func.func @kernel(%arg0: memref<16x128xbf16, #tpu.memory_space<vmem>>, %arg1: memref<128x128xbf16, #tpu.memory_space<vmem>>, %arg2: memref<1x128xf32, #tpu.memory_space<vmem>>, %arg3: memref<1x128xf32, #tpu.memory_space<vmem>>, %arg4: memref<1x128xf32, #tpu.memory_space<vmem>>, %arg5: memref<128x128xbf16, #tpu.memory_space<vmem>>, %arg6: memref<1x128xf32, #tpu.memory_space<vmem>>, %arg7: memref<16x128xf32, #tpu.memory_space<vmem>>) attributes {dimension_semantics = [], scalar_prefetch = 0 : i64, scratch_operands = 0 : i64, tpu.core_type = #tpu.core_type<tc>} {
    %c0 = arith.constant 0 : index
    %c0_0 = arith.constant 0 : index
    %0 = vector.load %arg0[%c0, %c0_0] : memref<16x128xbf16, #tpu.memory_space<vmem>>, vector<16x128xbf16>
    %c0_1 = arith.constant 0 : index
    %c0_2 = arith.constant 0 : index
    %1 = vector.load %arg1[%c0_1, %c0_2] : memref<128x128xbf16, #tpu.memory_space<vmem>>, vector<128x128xbf16>
    %cst = arith.constant dense<0.000000e+00> : vector<16x128xf32>
    %2 = tpu.matmul %0, %1, %cst {dimension_numbers = #tpu.dot_dimension_numbers<[1], [0], [0], [1], [0, 0, 1, 1], [], []>} : vector<16x128xbf16>, vector<128x128xbf16>, vector<16x128xf32> -> vector<16x128xf32>
    %c0_3 = arith.constant 0 : index
    %c0_4 = arith.constant 0 : index
    %3 = vector.load %arg2[%c0_3, %c0_4] : memref<1x128xf32, #tpu.memory_space<vmem>>, vector<1x128xf32>
    %4 = vector.broadcast %3 : vector<1x128xf32> to vector<16x128xf32>
    %5 = arith.addf %2, %4 : vector<16x128xf32>
    %cst_5 = arith.constant dense<0.000000e+00> : vector<128xf32>
    %6 = vector.multi_reduction <add>, %5, %cst_5 [0] : vector<16x128xf32> to vector<128xf32>
    %7 = vector.shape_cast %6 : vector<128xf32> to vector<1x128xf32>
    %cst_6 = arith.constant 1.600000e+01 : f32
    %8 = vector.broadcast %cst_6 : f32 to vector<1x128xf32>
    %9 = arith.divf %7, %8 : vector<1x128xf32>
    %10 = vector.broadcast %9 : vector<1x128xf32> to vector<16x128xf32>
    %11 = arith.subf %5, %10 : vector<16x128xf32>
    %12 = arith.mulf %11, %11 : vector<16x128xf32>
    %cst_7 = arith.constant dense<0.000000e+00> : vector<128xf32>
    %13 = vector.multi_reduction <add>, %12, %cst_7 [0] : vector<16x128xf32> to vector<128xf32>
    %14 = vector.shape_cast %13 : vector<128xf32> to vector<1x128xf32>
    %cst_8 = arith.constant 1.600000e+01 : f32
    %15 = vector.broadcast %cst_8 : f32 to vector<1x128xf32>
    %16 = arith.divf %14, %15 : vector<1x128xf32>
    %c0_9 = arith.constant 0 : index
    %c0_10 = arith.constant 0 : index
    %17 = vector.load %arg3[%c0_9, %c0_10] : memref<1x128xf32, #tpu.memory_space<vmem>>, vector<1x128xf32>
    %cst_11 = arith.constant 9.99999974E-6 : f32
    %18 = vector.broadcast %cst_11 : f32 to vector<1x128xf32>
    %19 = arith.addf %16, %18 : vector<1x128xf32>
    %20 = math.rsqrt %19 : vector<1x128xf32>
    %21 = arith.mulf %17, %20 : vector<1x128xf32>
    %c0_12 = arith.constant 0 : index
    %c0_13 = arith.constant 0 : index
    %22 = vector.load %arg4[%c0_12, %c0_13] : memref<1x128xf32, #tpu.memory_space<vmem>>, vector<1x128xf32>
    %23 = arith.mulf %9, %21 : vector<1x128xf32>
    %24 = arith.subf %22, %23 : vector<1x128xf32>
    %25 = vector.broadcast %21 : vector<1x128xf32> to vector<16x128xf32>
    %26 = arith.mulf %5, %25 : vector<16x128xf32>
    %27 = vector.broadcast %24 : vector<1x128xf32> to vector<16x128xf32>
    %28 = arith.addf %26, %27 : vector<16x128xf32>
    %cst_14 = arith.constant 0.000000e+00 : f32
    %29 = vector.broadcast %cst_14 : f32 to vector<16x128xf32>
    %30 = arith.maximumf %28, %29 : vector<16x128xf32>
    %31 = arith.truncf %30 : vector<16x128xf32> to vector<16x128xbf16>
    %c0_15 = arith.constant 0 : index
    %c0_16 = arith.constant 0 : index
    %32 = vector.load %arg5[%c0_15, %c0_16] : memref<128x128xbf16, #tpu.memory_space<vmem>>, vector<128x128xbf16>
    %cst_17 = arith.constant dense<0.000000e+00> : vector<16x128xf32>
    %33 = tpu.matmul %31, %32, %cst_17 {dimension_numbers = #tpu.dot_dimension_numbers<[1], [0], [0], [1], [0, 0, 1, 1], [], []>} : vector<16x128xbf16>, vector<128x128xbf16>, vector<16x128xf32> -> vector<16x128xf32>
    %c0_18 = arith.constant 0 : index
    %c0_19 = arith.constant 0 : index
    %34 = vector.load %arg6[%c0_18, %c0_19] : memref<1x128xf32, #tpu.memory_space<vmem>>, vector<1x128xf32>
    %35 = vector.broadcast %34 : vector<1x128xf32> to vector<16x128xf32>
    %36 = arith.addf %33, %35 : vector<16x128xf32>
    %c0_20 = arith.constant 0 : index
    %c0_21 = arith.constant 0 : index
    %37 = vector.load %arg7[%c0_20, %c0_21] : memref<16x128xf32, #tpu.memory_space<vmem>>, vector<16x128xf32>
    tpu.vector_store %arg7[%c0_20, %c0_21], %36 {strides = array<i32>} : memref<16x128xf32, #tpu.memory_space<vmem>>, vector<16x128xf32>,
    return
  }
}

</mosaic_0001>

<bundles_post_ra>
// kernel: out_layer_forward.1
= control target key start
LH: loop header
LB: loop body
LE: loop exit
PB: predicated region body
PF: predicated region fallthrough
CT: control target
= control target key end

     0   :  { %v352_v9 = vmov 16.0   ;;  %s472_s1 = inlined_call_operand.vmem [shape: bf16[128,128], index: 1, kind: input, shape index: {}]   ;;  %s473_s2 = inlined_call_operand.vmem [shape: f32[1,128], index: 2, kind: input, shape index: {}]   ;;  %s474_s0 = inlined_call_operand.vmem [shape: bf16[16,128], index: 0, kind: input, shape index: {}]   ;;  %s475_s6 = inlined_call_operand.vmem [shape: f32[1,128], index: 6, kind: input, shape index: {}]   ;;  %s476_s5 = inlined_call_operand.vmem [shape: bf16[128,128], index: 5, kind: input, shape index: {}]   ;;  %s477_s3 = inlined_call_operand.vmem [shape: f32[1,128], index: 3, kind: input, shape index: {}]   ;;  %s478_s4 = inlined_call_operand.vmem [shape: f32[1,128], index: 4, kind: input, shape index: {}]   ;;  %s479_s7 = inlined_call_operand.vmem [shape: f32[16,128], index: 7, kind: output, shape index: {}]  }
   0x1   :  { %v336_v0 = vld [vmem:[%s472_s1 + $0x38] sm:$0xff]  ;;  %v335_v1 = vld [vmem:[%s472_s1 + $0x30] sm:$0xff]  ;;  %v334_v2 = vld [vmem:[%s472_s1 + $0x28] sm:$0xff]  ;;  %348 = vrcp.f32 %v352_v9 }
   0x2   :  { %102 = vmatpush.bf16.msra.mxu0 %v336_v0  ;;  %v333_v3 = vld [vmem:[%s472_s1 + $0x20] sm:$0xff]  ;;  %v332_v4 = vld [vmem:[%s472_s1 + $0x18] sm:$0xff]  ;;  %v331_v5 = vld [vmem:[%s472_s1 + $0x10] sm:$0xff] }
   0x3   :  { %v330_v6 = vld [vmem:[%s472_s1 + $0x8] sm:$0xff]  ;;  %v329_v7 = vld [vmem:[%s472_s1] sm:$0xff]  ;;  %v344_v22 = vld [vmem:[%s476_s5 + $0x38] sm:$0xff] }
   0x4   :  { %v328_v8 = vld [vmem:[%s474_s0] sm:$0xff]  ;;  %240 = vmatpush.bf16.msra.mxu1 %v344_v22  ;;  %v343_v26 = vld [vmem:[%s476_s5 + $0x30] sm:$0xff]  ;;  %v342_v30 = vld [vmem:[%s476_s5 + $0x28] sm:$0xff] }
   0x5   :  { %v346_v12 = vld [vmem:[%s473_s2] ss:$0 sm:$0xff]  ;;  %v340_v38 = vld [vmem:[%s476_s5 + $0x18] sm:$0xff]  ;;  %v339_v41 = vld [vmem:[%s476_s5 + $0x10] sm:$0xff] }
   0x6   :  { %103 = vmatpush.bf16.msra.mxu0 %v335_v1  ;;  %v341_v34 = vld [vmem:[%s476_s5 + $0x20] sm:$0xff]  ;;  %v338_v44 = vld [vmem:[%s476_s5 + $0x8] sm:$0xff] }
   0x7   :  { %v349_v11 = vpop.eup %348  ;;  %v337_v46 = vld [vmem:[%s476_s5] sm:$0xff] }
   0x8   :  { %v124_v13 = vmul.f32 16.0, %v349_v11  ;;  %vm128_vm0 = vweird.f32 %v349_v11  ;;  %241 = vmatpush.bf16.msra.mxu1 %v343_v26  ;;  %v143_v55 = vld [vmem:[%s477_s3] sm:$0x1] }
   0x9   :  { %v156_v59 = vld [vmem:[%s478_s4] sm:$0x1] }
   0xa   :  { %104 = vmatpush.bf16.msra.mxu0 %v334_v2  ;;  %v125_v17 = vsub.f32 1.0, %v124_v13 }
   0xc   :  { %v126_v20 = vmul.f32 %v349_v11, %v125_v17  ;;  %242 = vmatpush.bf16.msra.mxu1 %v342_v30 }
   0xe   :  { %105 = vmatpush.bf16.msra.mxu0 %v333_v3  ;;  %v127_v24 = vadd.f32 %v349_v11, %v126_v20 }
  0x10   :  { %v129_v28 = vsel %vm128_vm0, %v349_v11, %v127_v24  ;;  %243 = vmatpush.bf16.msra.mxu1 %v341_v34 }
  0x12   :  { %106 = vmatpush.bf16.msra.mxu0 %v332_v4 }
  0x14   :  { %244 = vmatpush.bf16.msra.mxu1 %v340_v38 }
  0x16   :  { %107 = vmatpush.bf16.msra.mxu0 %v331_v5 }
  0x18   :  { %245 = vmatpush.bf16.msra.mxu1 %v339_v41 }
  0x1a   :  { %108 = vmatpush.bf16.msra.mxu0 %v330_v6 }
  0x1c   :  { %246 = vmatpush.bf16.msra.mxu1 %v338_v44 }
  0x1e   :  { %109 = vmatpush.bf16.msra.mxu0 %v329_v7  ;;  %v347_v7 = vld [vmem:[%s475_s6] ss:$0 sm:$0xff] }
  0x20   :  { %247 = vmatpush.bf16.msra.mxu1 %v337_v46 }
  0x21   :  { %110 = vmatmul.bf16.vlgmr.msra.gmra.mxu0 %v328_v8 }
  0x9e   :  { %v111_v10 = vpop.f32.mrf.mxu0 }
  0x9f   :  { %v423_v15 = vadd.f32 %v346_v12, %v111_v10 }
  0xa6   :  { %v113_v14 = vpop.f32.mrf.mxu0 }
  0xa7   :  { %v425_v16 = vadd.f32 %v346_v12, %v113_v14 }
  0xa9   :  { %v116_v18 = vadd.f32 %v425_v16, %v423_v15 }
  0xab   :  { %v117_v19 = vrot.slane %v116_v18, 4 }
  0xad   :  { %v118_v21 = vadd.f32 %v117_v19, %v116_v18 }
  0xaf   :  { %v119_v23 = vrot.slane %v118_v21, 2 }
  0xb1   :  { %v120_v25 = vadd.f32 %v119_v23, %v118_v21 }
  0xb3   :  { %v121_v27 = vrot.slane %v120_v25, 1 }
  0xb5   :  { %v122_v29 = vadd.f32 %v121_v27, %v120_v25 }
  0xb7   :  { %v130_v31 = vmul.f32 %v129_v28, %v122_v29 }
  0xb9   :  { %v131_v32 = vsub.f32 %v423_v15, %v130_v31  ;;  %v132_v33 = vsub.f32 %v425_v16, %v130_v31 }
  0xbb   :  { %v133_v35 = vmul.f32 %v131_v32, %v131_v32  ;;  %v134_v36 = vmul.f32 %v132_v33, %v132_v33 }
  0xbd   :  { %v135_v37 = vadd.f32 %v134_v36, %v133_v35 }
  0xbf   :  { %v136_v39 = vrot.slane %v135_v37, 4 }
  0xc1   :  { %v137_v40 = vadd.f32 %v136_v39, %v135_v37 }
  0xc3   :  { %v138_v42 = vrot.slane %v137_v40, 2 }
  0xc5   :  { %v139_v43 = vadd.f32 %v138_v42, %v137_v40 }
  0xc7   :  { %v140_v45 = vrot.slane %v139_v43, 1 }
  0xc9   :  { %v141_v47 = vadd.f32 %v140_v45, %v139_v43 }
  0xcb   :  { %v142_v48 = vmul.f32 %v141_v47, %v129_v28 }
  0xcd   :  { %v144_v49 = vadd.f32 1e-05, %v142_v48 }
  0xcf   :  { %350 = vrsqrt.f32 %v144_v49  ;;  %vm151_vm2 = vweird.f32 %v144_v49 }
  0xd5   :  { %v351_v50 = vpop.eup %350 }
  0xd6   :  { %v146_v51 = vmul.f32 %v351_v50, %v144_v49  ;;  %vm152_vm1 = vweird.f32 %v351_v50 }
  0xd7   :  { %vm153_vm3 = vmor %vm151_vm2, %vm152_vm1 }
  0xd8   :  { %v147_v52 = vmul.f32 %v351_v50, %v146_v51 }
  0xda   :  { %v148_v53 = vmul.f32 0.5, %v147_v52 }
  0xdc   :  { %v149_v54 = vsub.f32 1.5, %v148_v53 }
  0xde   :  { %v150_v56 = vmul.f32 %v351_v50, %v149_v54 }
  0xe0   :  { %v154_v57 = vsel %vm153_vm3, %v351_v50, %v150_v56 }
  0xe1   :  { %v155_v58 = vmul.f32 %v154_v57, %v143_v55 }
  0xe3   :  { %v160_v60 = vperm.slane %v155_v58, 0  ;;  %v157_v61 = vmul.f32 %v155_v58, %v130_v31 }
  0xe5   :  { %v158_v62 = vsub.f32 %v156_v59, %v157_v61  ;;  %v163_v63 = vmul.f32 %v160_v60, %v425_v16  ;;  %v162_v0 = vmul.f32 %v160_v60, %v423_v15 }
  0xe7   :  { %v165_v1 = vperm.slane %v158_v62, 0 }
  0xe9   :  { %v167_v2 = vadd.f32 %v165_v1, %v162_v0  ;;  %v168_v3 = vadd.f32 %v165_v1, %v163_v63 }
  0xeb   :  { %v169_v4 = vmax.f32 %v167_v2, 0.0  ;;  %v170_v5 = vmax.f32 %v168_v3, 0.0 }
  0xed   :  { %v171_v6 = vpack.c.bf16 %v170_v5, %v169_v4 }
  0xef   :  { %248 = vmatmul.bf16.vlgmr.msra.gmra.mxu1 %v171_v6 }
 0x16c   :  { %v249_v8 = vpop.f32.mrf.mxu1 }
 0x16d   :  { %v250_v9 = vadd.f32 %v347_v7, %v249_v8 }
 0x16f   :  { %254 = vst [vmem:[%s479_s7] sm:$0xff] %v250_v9 }
 0x174   :  { %v251_v10 = vpop.f32.mrf.mxu1 }
 0x175   :  { %v252_v11 = vadd.f32 %v347_v7, %v251_v10 }
 0x177   :  { %255 = vst [vmem:[%s479_s7 + $0x8] sm:$0xff] %v252_v11 }

</bundles_post_ra>
